<compile_context>
chip_gen: v7x
topology: tpu7x:2x2x1
jax: 0.10.0
libtpu: 0.0.40
codegen_flags: <defaults>
</compile_context>

<pallas_src>
import jax
import jax.numpy as jnp
from jax import lax
from jax.experimental import pallas as pl
from jax.experimental.pallas import tpu as pltpu


# ---------------------------------------------------------------------------
# Pallas kernel: fused ComplEx score for one tile of entities.
#   out[b, n] = sigmoid( ab[b] . W[n] ),  W[n] = [Wr[n] | Wi[n]]
# ---------------------------------------------------------------------------
def complex_score_kernel(ab_ref, w_ref, out_ref):
    # ab_ref : (B, 2D) f32 combined activations (grid-invariant, stays resident)
    # w_ref  : (TN, 2D) fused entity-table tile (bf16), streamed from HBM
    # out_ref: (B, TN)
    ab = ab_ref[...].astype(w_ref.dtype)          # tiny (B, 2D) cast, VPU slack
    # Contract the shared 2D axis (last dim of BOTH operands) — the canonical
    # "A @ W.T" form (same as flash-attention q @ k.T) that Mosaic lowers
    # straight to the MXU without a per-tile XLU transpose.
    # TODO(synk): confirm via pl.lower_as_mlir that no transpose is emitted on
    # the target generation; if it is, store the slab as (2D, E) instead.
    dn = (((1,), (1,)), ((), ()))
    logits = lax.dot_general(ab, w_ref[...], dn,
                             preferred_element_type=jnp.float32)
    out_ref[...] = jax.nn.sigmoid(logits).astype(out_ref.dtype)


# ---------------------------------------------------------------------------
# Load-time table prep (run ONCE, not per forward call).
# ---------------------------------------------------------------------------
def prepare_entity_table(emb_e_real, emb_e_img, table_dtype=jnp.bfloat16):
    """Fuse the real/imag entity tables into one contiguous (E, 2D) slab so the
    kernel streams a single contiguous DMA per tile. bf16 halves the HBM bytes
    of this bandwidth-bound kernel.
    TODO(synk): int8 (v5e/v6e) or fp8-e4m3 (v7x) tables with per-row scales
    (scale applied to the (B, TN) result before the sigmoid) would halve the
    table stream again; needs a per-generation dispatch so it is left out here.
    """
    return jnp.concatenate([emb_e_real, emb_e_img], axis=1).astype(table_dtype)


def _pick_tile_n(num_entities):
    # Keep >= 2 tiles so the "parallel" entity axis can split across a v7x
    # chip's two TensorCores; tiles of 0.25–2 MiB (bf16, 2D=256) sit near the
    # HBM roofline on v5e/v6e/v7x while staying far under VMEM limits.
    for t in (4096, 2048, 1024, 512, 256):
        if num_entities >= 2 * t:
            return t
    return 128


# ---------------------------------------------------------------------------
# Forward pass.
# ---------------------------------------------------------------------------
def complex_forward(e1, rel, entity_slab, emb_rel_real, emb_rel_img,
                    *, tile_n=None, out_dtype=jnp.float32):
    """ComplEx forward (dropout = identity).

    e1, rel      : int32 index arrays of shape (B, 1)  (matching the PyTorch usage)
    entity_slab  : (E, 2D) fused [Wr | Wi] table from prepare_entity_table
    emb_rel_*    : (R, D) relation tables
    returns      : (B, E) scores in (0, 1)

    NOTE: at large batch (B >~ 128) switch out_dtype to bf16 (or return raw
    logits) to cut the output writeback stream.
    """
    B = e1.shape[0]
    E, K2 = entity_slab.shape
    D = K2 // 2
    if tile_n is None:
        tile_n = _pick_tile_n(E)
    n_tiles = pl.cdiv(E, tile_n)

    # Embedding lookup (+ squeeze) — cheap gather glue in plain JAX. The e1
    # embeddings come straight out of the fused slab: row = [er | ei].
    e1_idx = e1.reshape(B)
    rel_idx = rel.reshape(B)
    e_emb = jnp.take(entity_slab, e1_idx, axis=0).astype(jnp.float32)   # (B, 2D)
    er, ei = e_emb[:, :D], e_emb[:, D:]
    rr = jnp.take(emb_rel_real, rel_idx, axis=0).astype(jnp.float32)    # (B, D)
    ri = jnp.take(emb_rel_img, rel_idx, axis=0).astype(jnp.float32)     # (B, D)

    # Hoisted, grid-invariant combines (kept in f32; cast happens in-kernel).
    ab = jnp.concatenate([er * rr - ei * ri, er * ri + ei * rr], axis=1)  # (B, 2D)

    tbytes = jnp.dtype(entity_slab.dtype).itemsize
    cost = pl.CostEstimate(
        flops=2 * B * K2 * E,                       # one (B,2D)x(2D,TN) dot/tile
        transcendentals=B * E,                      # sigmoid exp
        bytes_accessed=E * K2 * tbytes + B * K2 * 4
        + B * E * jnp.dtype(out_dtype).itemsize,
    )

    return pl.pallas_call(
        complex_score_kernel,
        out_shape=jax.ShapeDtypeStruct((B, E), out_dtype),
        grid_spec=pltpu.PrefetchScalarGridSpec(
            num_scalar_prefetch=0,
            grid=(n_tiles,),
            in_specs=[
                pl.BlockSpec((B, K2), lambda n: (0, 0)),        # ab, resident
                pl.BlockSpec((tile_n, K2), lambda n: (n, 0)),   # table tile, 2-buffered
            ],
            out_specs=pl.BlockSpec((B, tile_n), lambda n: (0, n)),
        ),
        compiler_params=pltpu.CompilerParams(
            dimension_semantics=("parallel",),      # entity axis shards across TCs
            vmem_limit_bytes=32 * 1024 * 1024,      # explicit (v5e scoped default is 16 MiB)
        ),
        cost_estimate=cost,
    )(ab, entity_slab)
    # TODO(synk): for large batch, add a TB x TN grid (batch axis "parallel")
    # to raise arithmetic intensity and keep the MXU busy.


# ---------------------------------------------------------------------------
# Deterministic parameter init (xavier_normal_ equivalent), padding_idx=0.
# ---------------------------------------------------------------------------
def init_params(key, num_entities, num_relations, embedding_dim):
    def xavier_normal(k, shape):
        fan_out, fan_in = shape
        std = (2.0 / (fan_in + fan_out)) ** 0.5
        w = jax.random.normal(k, shape, dtype=jnp.float32) * std
        return w.at[0].set(0.0)   # padding_idx=0 -> zero row 0

    k1, k2, k3, k4 = jax.random.split(key, 4)
    return dict(
        emb_e_real=xavier_normal(k1, (num_entities, embedding_dim)),
        emb_e_img=xavier_normal(k2, (num_entities, embedding_dim)),
        emb_rel_real=xavier_normal(k3, (num_relations, embedding_dim)),
        emb_rel_img=xavier_normal(k4, (num_relations, embedding_dim)),
    )


def reference_forward(e1, rel, emb_e_real, emb_e_img, emb_rel_real, emb_rel_img):
    """Pure-JAX reference mirroring the PyTorch forward (dropout = identity)."""
    B = e1.shape[0]
    er = jnp.take(emb_e_real, e1.reshape(B), axis=0).astype(jnp.float32)
    ei = jnp.take(emb_e_img, e1.reshape(B), axis=0).astype(jnp.float32)
    rr = jnp.take(emb_rel_real, rel.reshape(B), axis=0).astype(jnp.float32)
    ri = jnp.take(emb_rel_img, rel.reshape(B), axis=0).astype(jnp.float32)
    wr = emb_e_real.astype(jnp.float32)
    wi = emb_e_img.astype(jnp.float32)
    pred = ((er * rr) @ wr.T + (er * ri) @ wi.T
            + (ei * rr) @ wi.T - (ei * ri) @ wr.T)
    return jax.nn.sigmoid(pred)


if __name__ == "__main__":
    # Small, TPU-friendly shapes consistent with the module. num_entities is
    # deliberately NOT a multiple of tile_n to exercise the ragged last tile.
    num_entities = 2000
    num_relations = 32
    embedding_dim = 128
    batch = 8

    key = jax.random.PRNGKey(0)
    kp, ke, kr = jax.random.split(key, 3)

    params_f32 = init_params(kp, num_entities, num_relations, embedding_dim)

    # One-time, load-time table prep (NOT per forward call): fused bf16 slab.
    entity_slab = jax.block_until_ready(
        prepare_entity_table(params_f32["emb_e_real"], params_f32["emb_e_img"],
                             table_dtype=jnp.bfloat16))

    e1 = jax.random.randint(ke, (batch, 1), 0, num_entities, dtype=jnp.int32)
    rel = jax.random.randint(kr, (batch, 1), 0, num_relations, dtype=jnp.int32)

    fwd = jax.jit(complex_forward)
    pred = jax.block_until_ready(
        fwd(e1, rel, entity_slab,
            params_f32["emb_rel_real"], params_f32["emb_rel_img"]))
    assert pred.shape == (batch, num_entities)
    assert pred.dtype == jnp.float32

    # (1) Tight check vs. a pure-JAX reference on the same bf16 entity tables
    #     (validates kernel math, fused slab, ragged tiling, masked stores).
    ref_bf16 = jax.block_until_ready(reference_forward(
        e1, rel,
        entity_slab[:, :embedding_dim], entity_slab[:, embedding_dim:],
        params_f32["emb_rel_real"], params_f32["emb_rel_img"]))
    assert jnp.allclose(pred, ref_bf16, atol=2e-4, rtol=2e-4), \
        "mismatch vs bf16-table reference"

    # (2) Loose check vs. the original f32 weights (bf16 quantization error only).
    ref_f32 = jax.block_until_ready(reference_forward(
        e1, rel,
        params_f32["emb_e_real"], params_f32["emb_e_img"],
        params_f32["emb_rel_real"], params_f32["emb_rel_img"]))
    assert float(jnp.max(jnp.abs(pred - ref_f32))) < 1e-2, \
        "bf16 table quantization error too large vs f32 reference"

    print("KERNEL_OK")
</pallas_src>

<mosaic_0001>
module attributes {stable_mosaic.version = 11 : i64} {
  func.func @complex_score_kernel(%arg0: i32, %arg1: memref<8x256xf32, #tpu.memory_space<vmem>>, %arg2: memref<512x256xbf16, #tpu.memory_space<vmem>>, %arg3: memref<8x512xf32, #tpu.memory_space<vmem>>) attributes {dimension_semantics = [#tpu.dimension_semantics<parallel>], iteration_bounds = array<i64: 4>, scalar_prefetch = 0 : i64, scratch_operands = 0 : i64, tpu.core_type = #tpu.core_type<tc>, window_params = [{pipeline_mode = #tpu.pipeline_mode<synchronous>, transform_indices = @transform_0, window_bounds = array<i64: 8, 256>}, {transform_indices = @transform_1, window_bounds = array<i64: 512, 256>}, {transform_indices = @transform_2, window_bounds = array<i64: 8, 512>}]} {
    %c0 = arith.constant 0 : index
    %c0_0 = arith.constant 0 : index
    %0 = vector.load %arg1[%c0, %c0_0] : memref<8x256xf32, #tpu.memory_space<vmem>>, vector<8x256xf32>
    %1 = arith.truncf %0 : vector<8x256xf32> to vector<8x256xbf16>
    %c0_1 = arith.constant 0 : index
    %c0_2 = arith.constant 0 : index
    %2 = vector.load %arg2[%c0_1, %c0_2] : memref<512x256xbf16, #tpu.memory_space<vmem>>, vector<512x256xbf16>
    %cst = arith.constant dense<0.000000e+00> : vector<8x512xf32>
    %3 = tpu.matmul %1, %2, %cst {dimension_numbers = #tpu.dot_dimension_numbers<[1], [1], [0], [0], [0, 0, 1, 0], [], []>} : vector<8x256xbf16>, vector<512x256xbf16>, vector<8x512xf32> -> vector<8x512xf32>
    %4 = arith.negf %3 : vector<8x512xf32>
    %5 = math.exp %4 : vector<8x512xf32>
    %cst_3 = arith.constant 1.000000e+00 : f32
    %6 = vector.broadcast %cst_3 : f32 to vector<8x512xf32>
    %7 = arith.addf %6, %5 : vector<8x512xf32>
    %8 = arith.divf %6, %7 : vector<8x512xf32>
    %c0_4 = arith.constant 0 : index
    %c0_5 = arith.constant 0 : index
    %9 = vector.load %arg3[%c0_4, %c0_5] : memref<8x512xf32, #tpu.memory_space<vmem>>, vector<8x512xf32>
    tpu.vector_store %arg3[%c0_4, %c0_5], %8 {strides = array<i32>} : memref<8x512xf32, #tpu.memory_space<vmem>>, vector<8x512xf32>,
    return
  }
  func.func @transform_0(%arg0: i32) -> (i32, i32) {
    %c0_i32 = arith.constant 0 : i32
    %c0_i32_0 = arith.constant 0 : i32
    %c0_i32_1 = arith.constant 0 : i32
    return %c0_i32, %c0_i32_0 : i32, i32
  }
  func.func @transform_1(%arg0: i32) -> (i32, i32) {
    %c0_i32 = arith.constant 0 : i32
    %c0_i32_0 = arith.constant 0 : i32
    return %arg0, %c0_i32 : i32, i32
  }
  func.func @transform_2(%arg0: i32) -> (i32, i32) {
    %c0_i32 = arith.constant 0 : i32
    %c0_i32_0 = arith.constant 0 : i32
    return %c0_i32, %arg0 : i32, i32
  }
}

</mosaic_0001>

<bundles_post_ra>
// kernel: complex_forward.1
= control target key start
LH: loop header
LB: loop body
LE: loop exit
PB: predicated region body
PF: predicated region fallthrough
CT: control target
= control target key end

     0   :  { %7 = vsyncpa [#allocation3], 0  ;;  %s1347_s0 = inlined_call_operand.vmem [shape: f32[8,256], index: 0, kind: input, shape index: {}]   ;;  %s1348_s1 = inlined_call_operand.hbm [shape: bf16[2000,256], index: 1, kind: input, shape index: {}]   ;;  %s1349_s2 = inlined_call_operand.hbm [shape: f32[8,2000], index: 2, kind: output, shape index: {}]  }
   0x1   :  { %9 = vsyncpa [#allocation3 + $0x1], 0 }
   0x2   :  { %10 = vsyncpa [#allocation4], 0 }
   0x3   :  { %12 = vsyncpa [#allocation4 + $0x1], 0  ;;  %s1121_s9 = smov 0   ;;  %s1123_s10 = smov 0  }
   0x4   :  { %s1125_s11 = smov 0   ;;  %s1127_s12 = smov 0  }
   0x5 LB: > { %s1142_s13 = sadd.s32 4294967295, %s1100_s12   ;;  %s760_s14 = sadd.s32 4294967294, %s1100_s12   ;;  %s1100_s12 = sphi %s1127_s12, %s1357_s12   ;;  %s1096_s11 = sphi %s1125_s11, %s1356_s11   ;;  %s1092_s10 = sphi %s1123_s10, %s1355_s10   ;;  %s1088_s9 = sphi %s1121_s9, %s1354_s9  }
   0x6   : > { %s1146_s15 = sadd.s32 1, %s1100_s12   ;;  %s46_s16 = sadd.s32 1, %s1096_s11 }
   0x7   : > { %s43_s17 = ssub.s32 %s1100_s12, %s1146_s15  ;;  %p53_p0 = scmp.ne.s32.totalorder %s1096_s11, %s1092_s10 }
   0x8   : > { %p44_p1 = scmp.eq.s32.totalorder %s43_s17, 0  ;;  %p54_p2 = scmp.eq.s32.totalorder %s1100_s12, 0 }
   0x9   : > { %p59_p3 = scmp.ne.s32.totalorder %s1092_s10, %s1088_s9  ;;  %p60_p4 = scmp.eq.s32.totalorder %s1142_s13, 0 }
   0xa   : > { %s1158_s18 = scalar_select %p44_p1, %s1096_s11, %s46_s16  }
   0xb   : > { %p55_p5 = por %p54_p2, %p53_p0  ;;  %p1160_p6 = por %p60_p4, %p59_p3 }
   0xc   : > { %p83_p7 = scmp.eq.s32.totalorder %s1142_s13, 3  ;;  %p89_p8 = scmp.eq.s32.totalorder %s760_s14, 3 }
   0xd   : > { %p762_p11 = scmp.ge.s32.totalorder %s1100_s12, 4 }
   0xe   : > { %p1165_p9 = por %p83_p7, %p53_p0  ;;  %p1169_p10 = por %p89_p8, %p59_p3 }
   0xf   : > { %108 = sbr.rel (%p762_p11) target bundleno = 57 (0x39), region = 20 }
  0x10   : > { %s1352_s21 = scalar_select %p1169_p10, 1, 0 }
  0x16   : > { %111 = sbr.rel (!%p55_p5) target bundleno = 57 (0x39), region = 24  ;;  %s112_s22 = sand.u32 (%p55_p5), 1, %s1096_s11  }
  0x17   : > { %s764_s23 = sshll.u32 (%p55_p5), %s1100_s12, 6  ;;  %s763_s24 = sshll.u32 (%p55_p5), %s112_s22, 9 }
  0x18   : > { %s118_s25 = ssub.s32 (%p55_p5), 250, %s764_s23  ;;  %s1179_s28 = scalar_lea.sflag (%p55_p5), [#allocation3], %s112_s22 }
  0x19   : > { %p119_p12 = scmp.lt.s32.totalorder (%p55_p5), %s118_s25, 64  ;;  %s116_s29 = scalar_lea.vmem (%p55_p5), [#allocation2], %s763_s24 }
  0x1d   : > { %s1359_s25 = smov (!%p119_p12, %s118_s25), 64 }
  0x1e   : > { %s1176_s26 = sshll.u32 %s1359_s25, 7 }
  0x1f   : > { %s124_s27 = ssub.s32 8192, %s1176_s26 }
  0x20   : > { %125 = vsyncadd %s1179_s28, %s124_s27  ;;  %p767_p13 = scmp.ne.s32.totalorder %s1176_s26, 0  ;;  %s850_s30 = sshll.u32 %s1100_s12, 13 }
  0x21   : > { %s1187_s5 = scalar_lea.hbm %s1348_s1, %s850_s30  ;;  %s131_s6 = sshll.u32 %s116_s29, 4  ;;  %s1189_s6 = int_to_ptr.vmem [resolvable:$true] %s131_s6 }
  0x22   : > { %s1006_s7 = scalar_lea.hbm %s1187_s5, %s1176_s26  ;;  %s1010_s16 = scalar_lea.hbm %s1348_s1, 32000 }
  0x23   : > { %p1007_p0 = scmp.ne.s32.totalorder %s1187_s5, %s1006_s7  ;;  %p1011_p3 = scmp.lt.u32.totalorder %s1187_s5, %s1348_s1 }
  0x24   : > { %p1012_p4 = scmp.lt.u32.totalorder %s1010_s16, %s1006_s7  ;;  %p1014_p7 = scmp.lt.u32.totalorder %s1006_s7, %s1187_s5 }
  0x25   : > { %p1008_p1 = pnand %p1007_p0, %p767_p13 }
  0x26   : > { %p1013_p5 = por %p1012_p4, %p1011_p3 }
  0x27   : > { %p1009_p2 = pneg %p1008_p1 }
  0x28   : > { %p1015_p8 = por %p1014_p7, %p1013_p5 }
  0x2a   : > { %p1016_p11 = pnand %p1015_p8, %p1009_p2 }
  0x2c   : > { %1019 = shalt.err (!%p1016_p11)
}
  0x2d   : > { %s1020_s23 = scalar_lea.vmem %s1189_s6, %s1176_s26  ;;  %s1102_s24 = smov [#allocation2]  }
  0x2e   : > { %p1021_p12 = scmp.ne.s32.totalorder %s1189_s6, %s1020_s23  ;;  %s1024_s25 = sshll.u32 %s1102_s24, 4  ;;  %s1025_s25 = int_to_ptr.vmem [resolvable:$false] %s1024_s25 }
  0x2f   : > { %s1026_s27 = scalar_lea.vmem %s1025_s25, 16384  ;;  %p1027_p10 = scmp.lt.s32.totalorder %s1189_s6, %s1025_s25 }
  0x30   : > { %p1022_p0 = pnand %p1021_p12, %p767_p13  ;;  %p1028_p3 = scmp.lt.s32.totalorder %s1026_s27, %s1020_s23 }
  0x32   : > { %p1023_p1 = pneg %p1022_p0  ;;  %p1029_p4 = por %p1028_p3, %p1027_p10 }
  0x34   : > { %p1030_p5 = pnand %p1029_p4, %p1023_p1 }
  0x36   : > { %1033 = shalt.err (!%p1030_p5)
}
  0x37   : > { %s1103_s29 = smov 128   ;;  %s1104_s30 = smov 8  }
  0x38   : > { %137 = dma.hbm_to_vmem [thread:$0]  (%p767_p13), %s1187_s5, %s1176_s26, %s1189_s6, %s1179_s28, %s1103_s29, %s1103_s29, %s1104_s30  }
  0x39 PF: > { %p772_p2 = scmp.ge.s32.totalorder %s1100_s12, 1  ;;  %p139_p7 = scmp.lt.s32.totalorder %s1100_s12, 5 }
  0x3b   : > { %p140_p8 = pnand %p772_p2, %p139_p7 }
  0x3c   : > { %s1219_s3 = sand.u32 (!%p140_p8), 1, %s1092_s10  }
  0x3d   : > { %143 = sbr.rel (%p140_p8) target bundleno = 453 (0x1c5), region = 28  ;;  %s773_s4 = sshll.u32 (!%p140_p8), %s1219_s3, 9 }
  0x3e   : > { %s146_s7 = scalar_lea.sflag (!%p140_p8), [#allocation3], %s1219_s3  ;;  %s1223_s8 = scalar_lea.vmem (!%p140_p8), [#allocation2], %s773_s4 }
  0x44   : > { %1079 = dma.done.wait (%p1160_p6), %s146_s7, 8192  }
  0x45   : > { %1081 = vsyncadd (%p1160_p6), %s146_s7, 4294959104  ;;  %v894_v0 = vld [vmem:[%s1223_s8 + $0x4] ss:$8 sps:$4 sm:$0xff]   ;;  %v898_v2 = vld [vmem:[%s1223_s8] ss:$8 sps:$4 sm:$0xff]   ;;  %s774_s6 = sshll.u32 %s1219_s3, 5 }
  0x46   : > { %v896_v1 = vld [vmem:[%s1223_s8 + $0x104] ss:$8 sps:$4 sm:$0xff]   ;;  %565 = vmatprep.subr.bf16.mxu0 %v894_v0  ;;  %v899_v3 = vld [vmem:[%s1223_s8 + $0x100] ss:$8 sps:$4 sm:$0xff]   ;;  %v900_v4 = vld [vmem:[%s1223_s8 + $0x14] ss:$8 sps:$4 sm:$0xff]  }
  0x47   : > { %606 = vmatprep.subr.bf16.mxu1 %v896_v1  ;;  %566 = vmatpush1.bf16.xpose.msra.mxu0 %v898_v2  ;;  %v902_v5 = vld [vmem:[%s1223_s8 + $0x114] ss:$8 sps:$4 sm:$0xff]   ;;  %v904_v6 = vld [vmem:[%s1223_s8 + $0x10] ss:$8 sps:$4 sm:$0xff]   ;;  %v906_v8 = vld [vmem:[%s1223_s8 + $0x24] ss:$8 sps:$4 sm:$0xff]  }
  0x48   : > { %607 = vmatpush1.bf16.xpose.msra.mxu1 %v899_v3  ;;  %567 = vmatprep.subr.bf16.mxu0 %v900_v4  ;;  %v905_v7 = vld [vmem:[%s1223_s8 + $0x110] ss:$8 sps:$4 sm:$0xff]   ;;  %v908_v9 = vld [vmem:[%s1223_s8 + $0x124] ss:$8 sps:$4 sm:$0xff]   ;;  %v910_v10 = vld [vmem:[%s1223_s8 + $0x20] ss:$8 sps:$4 sm:$0xff]  }
  0x49   : > { %608 = vmatprep.subr.bf16.mxu1 %v902_v5  ;;  %v911_v11 = vld [vmem:[%s1223_s8 + $0x120] ss:$8 sps:$4 sm:$0xff]   ;;  %v912_v12 = vld [vmem:[%s1223_s8 + $0x34] ss:$8 sps:$4 sm:$0xff]   ;;  %v916_v14 = vld [vmem:[%s1223_s8 + $0x30] ss:$8 sps:$4 sm:$0xff]  }
  0x4a   : > { %v914_v13 = vld [vmem:[%s1223_s8 + $0x134] ss:$8 sps:$4 sm:$0xff]   ;;  %v917_v15 = vld [vmem:[%s1223_s8 + $0x130] ss:$8 sps:$4 sm:$0xff]   ;;  %v918_v16 = vld [vmem:[%s1223_s8 + $0x44] ss:$8 sps:$4 sm:$0xff]  }
  0x4b   : > { %v920_v17 = vld [vmem:[%s1223_s8 + $0x144] ss:$8 sps:$4 sm:$0xff]   ;;  %v922_v18 = vld [vmem:[%s1223_s8 + $0x40] ss:$8 sps:$4 sm:$0xff]   ;;  %v924_v20 = vld [vmem:[%s1223_s8 + $0x54] ss:$8 sps:$4 sm:$0xff]  }
  0x4c   : > { %v923_v19 = vld [vmem:[%s1223_s8 + $0x140] ss:$8 sps:$4 sm:$0xff]   ;;  %v926_v21 = vld [vmem:[%s1223_s8 + $0x154] ss:$8 sps:$4 sm:$0xff]   ;;  %v928_v22 = vld [vmem:[%s1223_s8 + $0x50] ss:$8 sps:$4 sm:$0xff]  }
  0x4d   : > { %v929_v23 = vld [vmem:[%s1223_s8 + $0x150] ss:$8 sps:$4 sm:$0xff]   ;;  %v930_v24 = vld [vmem:[%s1223_s8 + $0x64] ss:$8 sps:$4 sm:$0xff]   ;;  %v934_v28 = vld [vmem:[%s1223_s8 + $0x60] ss:$8 sps:$4 sm:$0xff]  }
  0x4e   : > { %v932_v25 = vld [vmem:[%s1223_s8 + $0x164] ss:$8 sps:$4 sm:$0xff]   ;;  %v935_v29 = vld [vmem:[%s1223_s8 + $0x160] ss:$8 sps:$4 sm:$0xff]   ;;  %v936_v30 = vld [vmem:[%s1223_s8 + $0x74] ss:$8 sps:$4 sm:$0xff]  }
  0x4f   : > { %568 = vmatpush1.bf16.xpose.msra.mxu0 %v904_v6  ;;  %v178_v26 = vld [vmem:[%s1347_s0 + $0x8] sm:$0xff]  ;;  %v938_v31 = vld [vmem:[%s1223_s8 + $0x174] ss:$8 sps:$4 sm:$0xff]   ;;  %v940_v32 = vld [vmem:[%s1223_s8 + $0x70] ss:$8 sps:$4 sm:$0xff]   ;;  %s851_s14 = sshll.u32 %s1142_s13, 9 }
  0x50   : > { %609 = vmatpush1.bf16.xpose.msra.mxu1 %v905_v7  ;;  %569 = vmatprep.subr.bf16.mxu0 %v906_v8  ;;  %v180_v27 = vpack.c.bf16 %v178_v26, %v178_v26  ;;  %v941_v33 = vld [vmem:[%s1223_s8 + $0x170] ss:$8 sps:$4 sm:$0xff]   ;;  %v942_v34 = vld [vmem:[%s1223_s8 + $0x84] ss:$8 sps:$4 sm:$0xff]   ;;  %v946_v36 = vld [vmem:[%s1223_s8 + $0x80] ss:$8 sps:$4 sm:$0xff]   ;;  %s1304_s24 = scalar_lea.hbm %s1349_s2, %s851_s14 }
  0x51   : > { %610 = vmatprep.subr.bf16.mxu1 %v908_v9  ;;  %v944_v35 = vld [vmem:[%s1223_s8 + $0x184] ss:$8 sps:$4 sm:$0xff]   ;;  %v947_v37 = vld [vmem:[%s1223_s8 + $0x180] ss:$8 sps:$4 sm:$0xff]   ;;  %v948_v38 = vld [vmem:[%s1223_s8 + $0x94] ss:$8 sps:$4 sm:$0xff]  }
  0x52   : > { %597 = vmatprep.mubr.bf16.mxu0 %v180_v27  ;;  %638 = vmatprep.mubr.bf16.mxu1 %v180_v27  ;;  %v950_v39 = vld [vmem:[%s1223_s8 + $0x194] ss:$8 sps:$4 sm:$0xff]   ;;  %v952_v40 = vld [vmem:[%s1223_s8 + $0x90] ss:$8 sps:$4 sm:$0xff]   ;;  %v954_v42 = vld [vmem:[%s1223_s8 + $0xa4] ss:$8 sps:$4 sm:$0xff]  }
  0x53   : > { %v953_v41 = vld [vmem:[%s1223_s8 + $0x190] ss:$8 sps:$4 sm:$0xff]   ;;  %v956_v43 = vld [vmem:[%s1223_s8 + $0x1a4] ss:$8 sps:$4 sm:$0xff]   ;;  %v958_v44 = vld [vmem:[%s1223_s8 + $0xa0] ss:$8 sps:$4 sm:$0xff]  }
  0x54   : > { %v959_v45 = vld [vmem:[%s1223_s8 + $0x1a0] ss:$8 sps:$4 sm:$0xff]   ;;  %v960_v46 = vld [vmem:[%s1223_s8 + $0xb4] ss:$8 sps:$4 sm:$0xff]   ;;  %v964_v48 = vld [vmem:[%s1223_s8 + $0xb0] ss:$8 sps:$4 sm:$0xff]  }
  0x55   : > { %v962_v47 = vld [vmem:[%s1223_s8 + $0x1b4] ss:$8 sps:$4 sm:$0xff]   ;;  %v965_v49 = vld [vmem:[%s1223_s8 + $0x1b0] ss:$8 sps:$4 sm:$0xff]   ;;  %v966_v50 = vld [vmem:[%s1223_s8 + $0xc4] ss:$8 sps:$4 sm:$0xff]  }
  0x56   : > { %v968_v51 = vld [vmem:[%s1223_s8 + $0x1c4] ss:$8 sps:$4 sm:$0xff]   ;;  %v970_v52 = vld [vmem:[%s1223_s8 + $0xc0] ss:$8 sps:$4 sm:$0xff]   ;;  %v972_v54 = vld [vmem:[%s1223_s8 + $0xd4] ss:$8 sps:$4 sm:$0xff]  }
  0x57   : > { %570 = vmatpush1.bf16.xpose.msra.mxu0 %v910_v10  ;;  %v971_v53 = vld [vmem:[%s1223_s8 + $0x1c0] ss:$8 sps:$4 sm:$0xff]   ;;  %v974_v55 = vld [vmem:[%s1223_s8 + $0x1d4] ss:$8 sps:$4 sm:$0xff]   ;;  %v976_v56 = vld [vmem:[%s1223_s8 + $0xd0] ss:$8 sps:$4 sm:$0xff]  }
  0x58   : > { %611 = vmatpush1.bf16.xpose.msra.mxu1 %v911_v11  ;;  %571 = vmatprep.subr.bf16.mxu0 %v912_v12  ;;  %v977_v57 = vld [vmem:[%s1223_s8 + $0x1d0] ss:$8 sps:$4 sm:$0xff]   ;;  %v978_v58 = vld [vmem:[%s1223_s8 + $0xe4] ss:$8 sps:$4 sm:$0xff]   ;;  %v982_v60 = vld [vmem:[%s1223_s8 + $0xe0] ss:$8 sps:$4 sm:$0xff]  }
  0x59   : > { %612 = vmatprep.subr.bf16.mxu1 %v914_v13  ;;  %v980_v59 = vld [vmem:[%s1223_s8 + $0x1e4] ss:$8 sps:$4 sm:$0xff]   ;;  %v983_v61 = vld [vmem:[%s1223_s8 + $0x1e0] ss:$8 sps:$4 sm:$0xff]   ;;  %v984_v62 = vld [vmem:[%s1223_s8 + $0xf4] ss:$8 sps:$4 sm:$0xff]  }
  0x5a   : > { %v986_v63 = vld [vmem:[%s1223_s8 + $0x1f4] ss:$8 sps:$4 sm:$0xff]   ;;  %v988_v0 = vld [vmem:[%s1223_s8 + $0xf0] ss:$8 sps:$4 sm:$0xff]   ;;  %v177_v2 = vld [vmem:[%s1347_s0] sm:$0xff]  ;;  %s169_s16 = scalar_lea.vmem [#allocation5], %s774_s6 }
  0x5b   : > { %v989_v1 = vld [vmem:[%s1223_s8 + $0x1f0] ss:$8 sps:$4 sm:$0xff]   ;;  %v179_v3 = vpack.c.bf16 %v177_v2, %v177_v2  ;;  %s690_s17 = sshll.u32 %s169_s16, 4  ;;  %s676_s13 = scalar_lea.sflag [#allocation4], %s1219_s3  ;;  %s1306_s17 = int_to_ptr.vmem [resolvable:$true] %s690_s17 }
  0x5c   : > { %s1034_s25 = scalar_lea.vmem %s1306_s17, 512  ;;  %s1105_s27 = smov [#allocation5]  }
  0x5d   : > { %p1035_p6 = scmp.ne.s32.totalorder %s1306_s17, %s1034_s25  ;;  %s1038_s29 = sshll.u32 %s1105_s27, 4  ;;  %s1039_s29 = int_to_ptr.vmem [resolvable:$false] %s1038_s29 }
  0x5e   : > { %s1040_s30 = scalar_lea.vmem %s1039_s29, 1024  ;;  %p1041_p11 = scmp.lt.s32.totalorder %s1306_s17, %s1039_s29 }
  0x5f   : > { %572 = vmatpush1.bf16.xpose.msra.mxu0 %v916_v14  ;;  %p1036_p10 = pnand %p1035_p6, %p1165_p9  ;;  %p1042_p12 = scmp.lt.s32.totalorder %s1040_s30, %s1034_s25 }
  0x60   : > { %613 = vmatpush1.bf16.xpose.msra.mxu1 %v917_v15  ;;  %573 = vmatprep.subr.bf16.mxu0 %v918_v16 }
  0x61   : > { %614 = vmatprep.subr.bf16.mxu1 %v920_v17  ;;  %p1037_p13 = pneg %p1036_p10  ;;  %p1043_p0 = por %p1042_p12, %p1041_p11 }
  0x63   : > { %p1044_p1 = pnand %p1043_p0, %p1037_p13 }
  0x67   : > { %574 = vmatpush1.bf16.xpose.msra.mxu0 %v922_v18 }
  0x68   : > { %615 = vmatpush1.bf16.xpose.msra.mxu1 %v923_v19  ;;  %575 = vmatprep.subr.bf16.mxu0 %v924_v20 }
  0x69   : > { %616 = vmatprep.subr.bf16.mxu1 %v926_v21 }
  0x6f   : > { %576 = vmatpush1.bf16.xpose.msra.mxu0 %v928_v22 }
  0x70   : > { %617 = vmatpush1.bf16.xpose.msra.mxu1 %v929_v23  ;;  %577 = vmatprep.subr.bf16.mxu0 %v930_v24 }
  0x71   : > { %618 = vmatprep.subr.bf16.mxu1 %v932_v25 }
  0x77   : > { %578 = vmatpush1.bf16.xpose.msra.mxu0 %v934_v28 }
  0x78   : > { %619 = vmatpush1.bf16.xpose.msra.mxu1 %v935_v29  ;;  %579 = vmatprep.subr.bf16.mxu0 %v936_v30 }
  0x79   : > { %620 = vmatprep.subr.bf16.mxu1 %v938_v31 }
  0x7f   : > { %580 = vmatpush1.bf16.xpose.msra.mxu0 %v940_v32 }
  0x80   : > { %621 = vmatpush1.bf16.xpose.msra.mxu1 %v941_v33  ;;  %581 = vmatprep.subr.bf16.mxu0 %v942_v34 }
  0x81   : > { %622 = vmatprep.subr.bf16.mxu1 %v944_v35 }
  0x87   : > { %582 = vmatpush1.bf16.xpose.msra.mxu0 %v946_v36 }
  0x88   : > { %623 = vmatpush1.bf16.xpose.msra.mxu1 %v947_v37  ;;  %583 = vmatprep.subr.bf16.mxu0 %v948_v38 }
  0x89   : > { %624 = vmatprep.subr.bf16.mxu1 %v950_v39 }
  0x8f   : > { %584 = vmatpush1.bf16.xpose.msra.mxu0 %v952_v40 }
  0x90   : > { %625 = vmatpush1.bf16.xpose.msra.mxu1 %v953_v41  ;;  %585 = vmatprep.subr.bf16.mxu0 %v954_v42 }
  0x91   : > { %626 = vmatprep.subr.bf16.mxu1 %v956_v43 }
  0x97   : > { %586 = vmatpush1.bf16.xpose.msra.mxu0 %v958_v44 }
  0x98   : > { %627 = vmatpush1.bf16.xpose.msra.mxu1 %v959_v45  ;;  %587 = vmatprep.subr.bf16.mxu0 %v960_v46 }
  0x99   : > { %628 = vmatprep.subr.bf16.mxu1 %v962_v47 }
  0x9f   : > { %588 = vmatpush1.bf16.xpose.msra.mxu0 %v964_v48 }
  0xa0   : > { %629 = vmatpush1.bf16.xpose.msra.mxu1 %v965_v49  ;;  %589 = vmatprep.subr.bf16.mxu0 %v966_v50 }
  0xa1   : > { %630 = vmatprep.subr.bf16.mxu1 %v968_v51 }
  0xa7   : > { %590 = vmatpush1.bf16.xpose.msra.mxu0 %v970_v52 }
  0xa8   : > { %631 = vmatpush1.bf16.xpose.msra.mxu1 %v971_v53  ;;  %591 = vmatprep.subr.bf16.mxu0 %v972_v54 }
  0xa9   : > { %632 = vmatprep.subr.bf16.mxu1 %v974_v55 }
  0xaf   : > { %592 = vmatpush1.bf16.xpose.msra.mxu0 %v976_v56 }
  0xb0   : > { %633 = vmatpush1.bf16.xpose.msra.mxu1 %v977_v57  ;;  %593 = vmatprep.subr.bf16.mxu0 %v978_v58 }
  0xb1   : > { %634 = vmatprep.subr.bf16.mxu1 %v980_v59 }
  0xb7   : > { %594 = vmatpush1.bf16.xpose.msra.mxu0 %v982_v60 }
  0xb8   : > { %635 = vmatpush1.bf16.xpose.msra.mxu1 %v983_v61  ;;  %595 = vmatprep.subr.bf16.mxu0 %v984_v62 }
  0xb9   : > { %636 = vmatprep.subr.bf16.mxu1 %v986_v63 }
  0xbf   : > { %596 = vmatpush1.bf16.xpose.msra.mxu0 %v988_v0 }
  0xc0   : > { %637 = vmatpush1.bf16.xpose.msra.mxu1 %v989_v1 }
  0xc6   : > { %598 = vmatmul.mubr.bf16.vlgmr.msra.gmra.mrb[0].mxu0 %v179_v3 }
  0xc7   : > { %639 = vmatmul.mubr.bf16.vlgmr.msra.gmra.mrb[0].mxu1 %v179_v3 }
 0x199   : > { %v599_v4 = vpop.f32.mrb[0].mxu0 }
 0x19a   : > { %v640_v5 = vpop.f32.mrb[0].mxu1  ;;  %v839_v6 = vmul.f32 -1.442695, %v599_v4  ;;  %v601_v8 = vpop.f32.mrb[1].mxu0 }
 0x19b   : > { %v841_v7 = vmul.f32 -1.442695, %v640_v5  ;;  %v642_v9 = vpop.f32.mrb[1].mxu1  ;;  %v840_v10 = vmul.f32 -1.442695, %v601_v8  ;;  %v603_v12 = vpop.f32.mrb[2].mxu0 }
 0x19c   : > { %v842_v11 = vmul.f32 -1.442695, %v642_v9  ;;  %v644_v13 = vpop.f32.mrb[2].mxu1  ;;  %990 = vpow2.f32 %v839_v6  ;;  %v604_v14 = vpop.f32.mrb[3].mxu0 }
 0x19d   : > { %v645_v15 = vpop.f32.mrb[3].mxu1  ;;  %992 = vpow2.f32 %v841_v7 }
 0x19e   : > { %994 = vpow2.f32 %v840_v10 }
 0x19f   : > { %996 = vpow2.f32 %v842_v11 }
 0x1a6   : > { %v991_v16 = vpop.eup %990 }
 0x1a7   : > { %v993_v17 = vpop.eup %992  ;;  %v659_v18 = vadd.f32 1.0, %v991_v16 }
 0x1a8   : > { %v995_v19 = vpop.eup %994  ;;  %v661_v20 = vadd.f32 1.0, %v993_v17 }
 0x1a9   : > { %v997_v21 = vpop.eup %996  ;;  %998 = vrcp.f32 %v659_v18  ;;  %v660_v22 = vadd.f32 1.0, %v995_v19 }
 0x1aa   : > { %1000 = vrcp.f32 %v661_v20  ;;  %v662_v23 = vadd.f32 1.0, %v997_v21 }
 0x1ab   : > { %1002 = vrcp.f32 %v660_v22 }
 0x1ac   : > { %1004 = vrcp.f32 %v662_v23 }
 0x1b3   : > { %v999_v24 = vpop.eup %998 }
 0x1b4   : > { %v1001_v25 = vpop.eup %1000  ;;  %671 = vst [vmem:[%s169_s16] sm:$0xff] %v999_v24 }
 0x1b5   : > { %v1003_v26 = vpop.eup %1002  ;;  %673 = vst [vmem:[%s169_s16 + $0x10] sm:$0xff] %v1001_v25 }
 0x1b6   : > { %v1005_v27 = vpop.eup %1004  ;;  %672 = vst [vmem:[%s169_s16 + $0x8] sm:$0xff] %v1003_v26 }
 0x1b7   : > { %674 = vst [vmem:[%s169_s16 + $0x18] sm:$0xff] %v1005_v27 }
 0x1b8   : > { %1047 = shalt.err (!%p1044_p1)
}
 0x1b9   : > { %s1048_s3 = scalar_lea.hbm %s1304_s24, 512  ;;  %s1052_s8 = scalar_lea.hbm %s1349_s2, 2048 }
 0x1ba   : > { %p1049_p3 = scmp.ne.s32.totalorder %s1304_s24, %s1048_s3  ;;  %p1053_p2 = scmp.lt.u32.totalorder %s1304_s24, %s1349_s2 }
 0x1bb   : > { %p1054_p7 = scmp.lt.u32.totalorder %s1052_s8, %s1048_s3  ;;  %p1056_p6 = scmp.lt.u32.totalorder %s1048_s3, %s1304_s24 }
 0x1bc   : > { %p1050_p4 = pnand %p1049_p3, %p1165_p9 }
 0x1bd   : > { %p1055_p8 = por %p1054_p7, %p1053_p2 }
 0x1be   : > { %p1051_p5 = pneg %p1050_p4 }
 0x1bf   : > { %p1057_p10 = por %p1056_p6, %p1055_p8 }
 0x1c1   : > { %p1058_p13 = pnand %p1057_p10, %p1051_p5 }
 0x1c3   : > { %1061 = shalt.err (!%p1058_p13)
}
 0x1c4   : > { %853 = dma.vmem_to_hbm [thread:$0]  (%p1165_p9), %s1306_s17, 512, %s1304_s24, %s676_s13  }
 0x1c5 PF: > { %p859_p11 = scmp.ge.s32.totalorder %s1100_s12, 2  ;;  %s702_s28 = sand.u32 1, %s1088_s9  }
 0x1c6   : > { %p1353_p12 = scmp.ne.s32.totalorder %s1352_s21, 0  ;;  %s703_s5 = scalar_lea.sflag [#allocation4], %s702_s28 }
 0x1c8   : > { %p856_p0 = pnand %p859_p11, %p1353_p12 }
 0x1ca   : > { %1083 = dma.done.wait (!%p856_p0), %s703_s5, 512  }
 0x1cb   : > { %1085 = vsyncadd (!%p856_p0), %s703_s5, 4294966784  ;;  %p15_p1 = scmp.ge.s32.totalorder %s1146_s15, 6   ;;  %s1354_s9 = smov %s1092_s10 }
 0x1cc   : > { %s1355_s10 = smov %s1096_s11  ;;  %s1356_s11 = smov %s1158_s18 }
 0x1cd   : > { %s1357_s12 = smov %s1146_s15  ;;  %17 = sbr.rel (!%p15_p1) target bundleno = 5 (0x5), region = 73 }
 0x1d4   :  { %708 = vsyncpa [#allocation3], 1 }
 0x1d5   :  { %710 = vsyncpa [#allocation3 + $0x1], 1 }
 0x1d6   :  { %711 = vsyncpa [#allocation4], 1 }
 0x1d7   :  { %713 = vsyncpa [#allocation4 + $0x1], 1 }

</bundles_post_ra>
